<compile_context>
chip_gen: v7x
topology: tpu7x:2x2x1
jax: 0.10.0
libtpu: 0.0.40
codegen_flags: <defaults>
</compile_context>

<pallas_src>
import functools

import jax
import jax.numpy as jnp
import numpy as np
from jax.experimental import pallas as pl
from jax.experimental.pallas import tpu as pltpu


def _epilogue(y, b_row, o_ref, eps):
    # y: (tm, N) f32 accumulated matmul; b_row: (1, N) bias.
    y = y + b_row.astype(jnp.float32)
    # l2norm along the last (embed) dim: X / (sqrt(sum(X^2)) + eps)
    norm = jnp.sqrt(jnp.sum(y * y, axis=-1, keepdims=True)) + eps
    # Per-row exact reciprocal + broadcast mul (approx=True would move it to
    # the EUP but risks the 1e-5 tolerance).
    inv = pl.reciprocal(norm, approx=False)
    o_ref[...] = (y * inv).astype(o_ref.dtype)


def _encoder_kernel_fused(x_ref, w_ref, b_ref, o_ref, *, eps):
    # x_ref: (tm, K)   w_ref: (K, N)   b_ref: (1, N)   o_ref: (tm, N)
    y = jnp.dot(x_ref[...], w_ref[...], preferred_element_type=jnp.float32)
    _epilogue(y, b_ref[...], o_ref, eps)


def _encoder_kernel_ktiled(x_ref, w_ref, b_ref, o_ref, acc_ref, *, eps):
    # x_ref: (tm, tk)  w_ref: (tk, N)  b_ref: (1, N)
    # o_ref: (tm, N)   acc_ref: (tm, N) f32 scratch accumulator
    k = pl.program_id(1)

    @pl.when(k == 0)
    def _():
        acc_ref[...] = jnp.zeros_like(acc_ref)

    acc_ref[...] += jnp.dot(
        x_ref[...], w_ref[...], preferred_element_type=jnp.float32
    )

    @pl.when(k == pl.num_programs(1) - 1)
    def _():
        _epilogue(acc_ref[...], b_ref[...], o_ref, eps)


def _round_up(x, m):
    return (x + m - 1) // m * m


def encoder_image_precomp(images, weight, bias, *, eps=1e-8, tm=256, tk=512):
    """images: (B, R, img_dim) f32; weight: (embed, img_dim); bias: (embed,)."""
    B, R, K = images.shape
    N = weight.shape[0]
    M = B * R

    # Pad K / N to full 128-lane vregs; keeps loads/stores unmasked.
    K_pad = _round_up(K, 128)
    N_pad = _round_up(N, 128)

    # Tile sizes: tm multiple of 8 (f32 sublane), tk multiple of 128,
    # auto-shrunk so the double-buffered working set fits a conservative
    # VMEM budget (v7x = 64 MiB per TC; leave headroom).
    def est_bytes(t_m, t_k):
        return 4 * (
            2 * t_m * t_k          # x tile, double-buffered
            + 2 * t_k * N_pad      # weight slab, double-buffered
            + 2 * N_pad            # bias
            + 2 * t_m * N_pad      # out tile, double-buffered
            + t_m * N_pad          # f32 accumulator scratch
        )

    vmem_budget = 40 * 1024 * 1024

    tk_eff = min(_round_up(tk, 128), K_pad)
    tm_eff = min(_round_up(tm, 8), _round_up(M, 8))
    while tm_eff > 8 and est_bytes(tm_eff, tk_eff) > vmem_budget:
        tm_eff = max(8, _round_up(tm_eff // 2, 8))
    while tk_eff > 128 and est_bytes(tm_eff, tk_eff) > vmem_budget:
        tk_eff = max(128, _round_up(tk_eff // 2, 128))
    # TODO(synk): if N_pad alone is so large that even (8, 128) tiles blow
    # VMEM, an N grid axis with a two-pass norm would be needed.

    K_pad = _round_up(K_pad, tk_eff)   # K_pad divisible by tk_eff
    M_pad = _round_up(M, tm_eff)
    k_blocks = K_pad // tk_eff

    # Zero-pad inputs only when needed; pre-transpose weight once to (K, N)
    # (natural MXU layout, lane-dense output).
    x2d = images.reshape(M, K)
    if (M_pad, K_pad) != (M, K):
        x2d = jnp.zeros((M_pad, K_pad), images.dtype).at[:M, :K].set(x2d)
    w_kn = weight.T
    if (K_pad, N_pad) != (K, N):
        w_kn = jnp.zeros((K_pad, N_pad), weight.dtype).at[:K, :N].set(w_kn)
    b2d = bias.reshape(1, N)
    if N_pad != N:
        b2d = jnp.zeros((1, N_pad), bias.dtype).at[:, :N].set(b2d)

    vmem_limit = int(
        min(max(est_bytes(tm_eff, tk_eff) * 5 // 4, 16 * 2**20), 64 * 2**20)
    )

    if k_blocks == 1:
        # Whole reduction dim resident: fused single-pass kernel, no scratch.
        grid_spec = pltpu.PrefetchScalarGridSpec(
            num_scalar_prefetch=0,
            grid=(M_pad // tm_eff,),
            in_specs=[
                pl.BlockSpec((tm_eff, K_pad), lambda i: (i, 0)),  # activations
                pl.BlockSpec((K_pad, N_pad), lambda i: (0, 0)),   # weight (K,N)
                pl.BlockSpec((1, N_pad), lambda i: (0, 0)),       # bias
            ],
            out_specs=pl.BlockSpec((tm_eff, N_pad), lambda i: (i, 0)),
        )
        kernel = functools.partial(_encoder_kernel_fused, eps=eps)
        dim_sem = ("parallel",)
    else:
        # K streamed in slabs; accumulate in f32 VMEM scratch.
        grid_spec = pltpu.PrefetchScalarGridSpec(
            num_scalar_prefetch=0,
            grid=(M_pad // tm_eff, k_blocks),
            in_specs=[
                pl.BlockSpec((tm_eff, tk_eff), lambda i, k: (i, k)),
                pl.BlockSpec((tk_eff, N_pad), lambda i, k: (k, 0)),
                pl.BlockSpec((1, N_pad), lambda i, k: (0, 0)),
            ],
            out_specs=pl.BlockSpec((tm_eff, N_pad), lambda i, k: (i, 0)),
            scratch_shapes=[pltpu.VMEM((tm_eff, N_pad), jnp.float32)],
        )
        kernel = functools.partial(_encoder_kernel_ktiled, eps=eps)
        dim_sem = ("parallel", "arbitrary")

    out = pl.pallas_call(
        kernel,
        out_shape=jax.ShapeDtypeStruct((M_pad, N_pad), images.dtype),
        grid_spec=grid_spec,
        compiler_params=pltpu.CompilerParams(
            dimension_semantics=dim_sem,
            vmem_limit_bytes=vmem_limit,
        ),
    )(x2d, w_kn, b2d)

    return out[:M, :N].reshape(B, R, N)


def init_params(key, img_dim, embed_size):
    """Xavier-uniform init matching EncoderImagePrecomp._init_weights."""
    r = np.sqrt(6.0) / np.sqrt(img_dim + embed_size)
    weight = jax.random.uniform(
        key, (embed_size, img_dim), jnp.float32, minval=-r, maxval=r
    )
    bias = jnp.zeros((embed_size,), jnp.float32)
    return weight, bias


def reference(images, weight, bias, eps=1e-8):
    y = jnp.einsum("brk,nk->brn", images, weight) + bias
    norm = jnp.sqrt(jnp.sum(y * y, axis=-1, keepdims=True)) + eps
    return y / norm


if __name__ == "__main__":
    # TODO(synk): self_attention=True branch (SummaryAttn) not implemented;
    # default constructor path (self_attention=False, no_imgnorm=False) only.
    batch, n_regions, img_dim, embed_size = 2, 8, 32, 32

    key = jax.random.PRNGKey(0)
    k_img, k_w, k_b = jax.random.split(key, 3)

    images = jax.random.normal(
        k_img, (batch, n_regions, img_dim), dtype=jnp.float32
    )
    weight, bias = init_params(k_w, img_dim, embed_size)

    # Check 1: module init (zero bias).
    features = jax.block_until_ready(
        encoder_image_precomp(images, weight, bias)
    )
    np.testing.assert_allclose(
        np.asarray(features), np.asarray(reference(images, weight, bias)),
        rtol=1e-5, atol=1e-5,
    )

    # Check 2: non-zero bias (exercises the bias-add path with padding).
    bias2 = 0.1 * jax.random.normal(k_b, (embed_size,), dtype=jnp.float32)
    features2 = jax.block_until_ready(
        encoder_image_precomp(images, weight, bias2)
    )
    np.testing.assert_allclose(
        np.asarray(features2), np.asarray(reference(images, weight, bias2)),
        rtol=1e-5, atol=1e-5,
    )

    # Check 3: shapes that force the K-tiled (reduction-grid) path.
    img_dim_big, embed_big, rows = 1024, 256, 24
    k1, k2 = jax.random.split(k_b)
    images_big = jax.random.normal(
        k1, (2, rows, img_dim_big), dtype=jnp.float32
    )
    weight_big, _ = init_params(k2, img_dim_big, embed_big)
    bias_big = 0.05 * jax.random.normal(k2, (embed_big,), dtype=jnp.float32)
    out_big = jax.block_until_ready(
        encoder_image_precomp(images_big, weight_big, bias_big, tk=256)
    )
    np.testing.assert_allclose(
        np.asarray(out_big),
        np.asarray(reference(images_big, weight_big, bias_big)),
        rtol=1e-5, atol=1e-5,
    )

    print("KERNEL_OK")
</pallas_src>

<mosaic_0001>
module attributes {stable_mosaic.version = 11 : i64} {
  func.func @_encoder_kernel_fused(%arg0: i32, %arg1: memref<16x128xf32, #tpu.memory_space<vmem>>, %arg2: memref<128x128xf32, #tpu.memory_space<vmem>>, %arg3: memref<1x128xf32, #tpu.memory_space<vmem>>, %arg4: memref<16x128xf32, #tpu.memory_space<vmem>>) attributes {dimension_semantics = [#tpu.dimension_semantics<parallel>], iteration_bounds = array<i64: 1>, scalar_prefetch = 0 : i64, scratch_operands = 0 : i64, tpu.core_type = #tpu.core_type<tc>, window_params = [{transform_indices = @transform_0, window_bounds = array<i64: 16, 128>}, {pipeline_mode = #tpu.pipeline_mode<synchronous>, transform_indices = @transform_1, window_bounds = array<i64: 128, 128>}, {pipeline_mode = #tpu.pipeline_mode<synchronous>, transform_indices = @transform_2, window_bounds = array<i64: 1, 128>}, {transform_indices = @transform_3, window_bounds = array<i64: 16, 128>}]} {
    %c0 = arith.constant 0 : index
    %c0_0 = arith.constant 0 : index
    %0 = vector.load %arg1[%c0, %c0_0] : memref<16x128xf32, #tpu.memory_space<vmem>>, vector<16x128xf32>
    %c0_1 = arith.constant 0 : index
    %c0_2 = arith.constant 0 : index
    %1 = vector.load %arg2[%c0_1, %c0_2] : memref<128x128xf32, #tpu.memory_space<vmem>>, vector<128x128xf32>
    %cst = arith.constant dense<0.000000e+00> : vector<16x128xf32>
    %2 = tpu.matmul %0, %1, %cst {dimension_numbers = #tpu.dot_dimension_numbers<[1], [0], [0], [1], [0, 0, 1, 1], [], []>} : vector<16x128xf32>, vector<128x128xf32>, vector<16x128xf32> -> vector<16x128xf32>
    %c0_3 = arith.constant 0 : index
    %c0_4 = arith.constant 0 : index
    %3 = vector.load %arg3[%c0_3, %c0_4] : memref<1x128xf32, #tpu.memory_space<vmem>>, vector<1x128xf32>
    %4 = vector.broadcast %3 : vector<1x128xf32> to vector<16x128xf32>
    %5 = arith.addf %2, %4 : vector<16x128xf32>
    %6 = arith.mulf %5, %5 : vector<16x128xf32>
    %cst_5 = arith.constant dense<0.000000e+00> : vector<16xf32>
    %7 = vector.multi_reduction <add>, %6, %cst_5 [1] : vector<16x128xf32> to vector<16xf32>
    %8 = vector.shape_cast %7 : vector<16xf32> to vector<16x1xf32>
    %9 = math.sqrt %8 : vector<16x1xf32>
    %cst_6 = arith.constant 9.99999993E-9 : f32
    %10 = vector.broadcast %cst_6 : f32 to vector<16x1xf32>
    %11 = arith.addf %9, %10 : vector<16x1xf32>
    %12 = tpu.reciprocal %11 : vector<16x1xf32> -> vector<16x1xf32>
    %13 = vector.broadcast %12 : vector<16x1xf32> to vector<16x128xf32>
    %14 = arith.mulf %5, %13 : vector<16x128xf32>
    %c0_7 = arith.constant 0 : index
    %c0_8 = arith.constant 0 : index
    %15 = vector.load %arg4[%c0_7, %c0_8] : memref<16x128xf32, #tpu.memory_space<vmem>>, vector<16x128xf32>
    tpu.vector_store %arg4[%c0_7, %c0_8], %14 {strides = array<i32>} : memref<16x128xf32, #tpu.memory_space<vmem>>, vector<16x128xf32>,
    return
  }
  func.func @transform_0(%arg0: i32) -> (i32, i32) {
    %c0_i32 = arith.constant 0 : i32
    %c0_i32_0 = arith.constant 0 : i32
    return %arg0, %c0_i32 : i32, i32
  }
  func.func @transform_1(%arg0: i32) -> (i32, i32) {
    %c0_i32 = arith.constant 0 : i32
    %c0_i32_0 = arith.constant 0 : i32
    %c0_i32_1 = arith.constant 0 : i32
    return %c0_i32, %c0_i32_0 : i32, i32
  }
  func.func @transform_2(%arg0: i32) -> (i32, i32) {
    %c0_i32 = arith.constant 0 : i32
    %c0_i32_0 = arith.constant 0 : i32
    %c0_i32_1 = arith.constant 0 : i32
    return %c0_i32, %c0_i32_0 : i32, i32
  }
  func.func @transform_3(%arg0: i32) -> (i32, i32) {
    %c0_i32 = arith.constant 0 : i32
    %c0_i32_0 = arith.constant 0 : i32
    return %arg0, %c0_i32 : i32, i32
  }
}

</mosaic_0001>

<bundles_post_ra>
// kernel: tpu_custom_call.1
= control target key start
LH: loop header
LB: loop body
LE: loop exit
PB: predicated region body
PF: predicated region fallthrough
CT: control target
= control target key end

     0   :  { %8 = vsyncpa [#allocation3], 0  ;;  %s433_s0 = inlined_call_operand.hbm [shape: f32[16,128], index: 0, kind: input, shape index: {}]   ;;  %s434_s1 = inlined_call_operand.hbm [shape: f32[128,128], index: 1, kind: input, shape index: {}]   ;;  %s435_s2 = inlined_call_operand.vmem [shape: f32[1,128], index: 2, kind: input, shape index: {}]   ;;  %s436_s3 = inlined_call_operand.hbm [shape: f32[16,128], index: 3, kind: output, shape index: {}]  }
   0x1   :  { %9 = vsyncpa [#allocation6], 0 }
   0x2   :  { %10 = vsyncpa [#allocation4], 0  ;;  %s360_s12 = smov [#allocation2]   ;;  %s288_s16 = scalar_lea.hbm %s433_s0, 256 }
   0x3   :  { %s16_s13 = sshll.u32 %s360_s12, 4  ;;  %p289_p0 = scmp.ne.s32.totalorder %s433_s0, %s288_s16  ;;  %s17_s13 = int_to_ptr.vmem [resolvable:$true] %s16_s13 }
   0x4   :  { %p292_p1 = scmp.lt.u32.totalorder %s288_s16, %s433_s0 }
   0x6   :  { %p294_p2 = pnand %p292_p1, %p289_p0 }
   0x8   :  { %297 = shalt.err (!%p294_p2)
}
   0x9   :  { %s298_s21 = scalar_lea.vmem %s17_s13, 256  ;;  %p303_p4 = scmp.lt.s32.totalorder %s17_s13, %s17_s13 }
   0xa   :  { %p299_p3 = scmp.ne.s32.totalorder %s17_s13, %s298_s21  ;;  %p304_p5 = scmp.lt.s32.totalorder %s298_s21, %s298_s21 }
   0xc   :  { %p305_p6 = por %p304_p5, %p303_p4 }
   0xe   :  { %p306_p7 = pnand %p305_p6, %p299_p3 }
  0x10   :  { %309 = shalt.err (!%p306_p7)
}
  0x11   :  { %s361_s22 = smov 128   ;;  %s362_s23 = smov 8  }
  0x12   :  { %22 = dma.hbm_to_vmem [thread:$0]  %s433_s0, 256, %s17_s13, [#allocation3], %s361_s22, %s361_s22, %s362_s23  }
  0x13   :  { %s363_s26 = smov [#allocation5]   ;;  %s310_s30 = scalar_lea.hbm %s434_s1, 2048 }
  0x14   :  { %s28_s27 = sshll.u32 %s363_s26, 4  ;;  %p311_p8 = scmp.ne.s32.totalorder %s434_s1, %s310_s30  ;;  %s29_s27 = int_to_ptr.vmem [resolvable:$true] %s28_s27 }
  0x15   :  { %p314_p9 = scmp.lt.u32.totalorder %s310_s30, %s434_s1 }
  0x17   :  { %p316_p10 = pnand %p314_p9, %p311_p8 }
  0x19   :  { %319 = shalt.err (!%p316_p10)
}
  0x1a   :  { %s320_s8 = scalar_lea.vmem %s29_s27, 2048  ;;  %p325_p12 = scmp.lt.s32.totalorder %s29_s27, %s29_s27 }
  0x1b   :  { %p321_p11 = scmp.ne.s32.totalorder %s29_s27, %s320_s8  ;;  %p326_p13 = scmp.lt.s32.totalorder %s320_s8, %s320_s8 }
  0x1d   :  { %p327_p0 = por %p326_p13, %p325_p12 }
  0x1f   :  { %p328_p1 = pnand %p327_p0, %p321_p11 }
  0x21   :  { %331 = shalt.err (!%p328_p1)
}
  0x22   :  { %34 = dma.hbm_to_vmem [thread:$0]  %s434_s1, 2048, %s29_s27, [#allocation6], %s361_s22, %s361_s22, %s362_s23  }
  0x23   :  { %354 = dma.done.wait [#allocation3], 256  }
  0x24   :  { %355 = vsyncadd [#allocation3], 4294967040 }
  0x25   :  { %356 = dma.done.wait [#allocation6], 2048  }
  0x26   :  { %357 = vsyncadd [#allocation6], 4294965248  ;;  %v45_v0 = vld [vmem:[#allocation5] sm:$0xff]  ;;  %v46_v1 = vld [vmem:[#allocation5 + $0x8] sm:$0xff] }
  0x27   :  { %v47_v2 = vld [vmem:[#allocation5 + $0x10] sm:$0xff]  ;;  %v243_v3 = vpack.c.bf16 %v46_v1, %v45_v0  ;;  %v48_v4 = vld [vmem:[#allocation5 + $0x18] sm:$0xff]  ;;  %v49_v6 = vld [vmem:[#allocation5 + $0x20] sm:$0xff] }
  0x28   :  { %v247_v5 = vpack.c.bf16 %v48_v4, %v47_v2  ;;  %v50_v7 = vld [vmem:[#allocation5 + $0x28] sm:$0xff]  ;;  %v43_v9 = vld [vmem:[#allocation2] sm:$0xff]  ;;  %v52_v11 = vld [vmem:[#allocation5 + $0x38] sm:$0xff] }
  0x29   :  { %244 = vmatprep.subr.bf16.mxu0 %v243_v3  ;;  %v251_v8 = vpack.c.bf16 %v50_v7, %v49_v6  ;;  %v51_v10 = vld [vmem:[#allocation5 + $0x30] sm:$0xff]  ;;  %240 = vmatprep.mubr.f32.mxu0 %v43_v9  ;;  %v53_v13 = vld [vmem:[#allocation5 + $0x40] sm:$0xff]  ;;  %v54_v14 = vld [vmem:[#allocation5 + $0x48] sm:$0xff] }
  0x2a   :  { %246 = vmatpush3.bf16.msra.mxu0 %v243_v3  ;;  %v255_v12 = vpack.c.bf16 %v52_v11, %v51_v10  ;;  %v259_v15 = vpack.c.bf16 %v54_v14, %v53_v13  ;;  %v55_v16 = vld [vmem:[#allocation5 + $0x50] sm:$0xff]  ;;  %v56_v17 = vld [vmem:[#allocation5 + $0x58] sm:$0xff]  ;;  %v57_v19 = vld [vmem:[#allocation5 + $0x60] sm:$0xff] }
  0x2b   :  { %248 = vmatprep.subr.bf16.mxu0 %v247_v5  ;;  %v263_v18 = vpack.c.bf16 %v56_v17, %v55_v16  ;;  %v58_v20 = vld [vmem:[#allocation5 + $0x68] sm:$0xff]  ;;  %v59_v22 = vld [vmem:[#allocation5 + $0x70] sm:$0xff]  ;;  %v60_v23 = vld [vmem:[#allocation5 + $0x78] sm:$0xff] }
  0x2c   :  { %v267_v21 = vpack.c.bf16 %v58_v20, %v57_v19  ;;  %v271_v24 = vpack.c.bf16 %v60_v23, %v59_v22  ;;  %v44_v25 = vld [vmem:[#allocation2 + $0x8] sm:$0xff]  ;;  %v189_v26 = vld [vmem:[%s435_s2] ss:$0 sm:$0xff]  ;;  %s364_s2 = smov [#allocation7]  }
  0x2d   :  { %s176_s11 = sshll.u32 %s364_s2, 4  ;;  %s177_s11 = int_to_ptr.vmem [resolvable:$true] %s176_s11 }
  0x2e   :  { %250 = vmatpush3.bf16.msra.mxu0 %v247_v5  ;;  %s332_s12 = scalar_lea.vmem %s177_s11, 256  ;;  %p337_p3 = scmp.lt.s32.totalorder %s177_s11, %s177_s11 }
  0x2f   :  { %252 = vmatprep.subr.bf16.mxu0 %v251_v8  ;;  %p333_p2 = scmp.ne.s32.totalorder %s177_s11, %s332_s12  ;;  %p338_p4 = scmp.lt.s32.totalorder %s332_s12, %s332_s12 }
  0x31   :  { %p339_p5 = por %p338_p4, %p337_p3 }
  0x32   :  { %254 = vmatpush3.bf16.msra.mxu0 %v251_v8 }
  0x33   :  { %256 = vmatprep.subr.bf16.mxu0 %v255_v12  ;;  %p340_p6 = pnand %p339_p5, %p333_p2 }
  0x36   :  { %258 = vmatpush3.bf16.msra.mxu0 %v255_v12 }
  0x37   :  { %260 = vmatprep.subr.bf16.mxu0 %v259_v15 }
  0x3a   :  { %262 = vmatpush3.bf16.msra.mxu0 %v259_v15 }
  0x3b   :  { %264 = vmatprep.subr.bf16.mxu0 %v263_v18 }
  0x3e   :  { %266 = vmatpush3.bf16.msra.mxu0 %v263_v18 }
  0x3f   :  { %268 = vmatprep.subr.bf16.mxu0 %v267_v21 }
  0x42   :  { %270 = vmatpush3.bf16.msra.mxu0 %v267_v21 }
  0x43   :  { %272 = vmatprep.subr.bf16.mxu0 %v271_v24 }
  0x46   :  { %274 = vmatpush3.bf16.msra.mxu0 %v271_v24 }
  0x49   :  { %241 = vmatmul.mubr.f32.vlgmr.msra.gmra.mrb[0].mxu0 %v44_v25 }
 0x11c   :  { %v242_v27 = vpop.f32.mrb[0].mxu0 }
 0x11d   :  { %v134_v28 = vpop.f32.mrb[1].mxu0  ;;  %v140_v30 = vadd.f32 %v242_v27, %v189_v26 }
 0x11e   :  { %v135_v29 = vadd.f32 %v189_v26, %v134_v28 }
 0x11f   :  { %v144_v32 = vmul.f32 %v140_v30, %v140_v30 }
 0x120   :  { %v143_v31 = vmul.f32 %v135_v29, %v135_v29 }
 0x122   :  { %145 = vadd.xlane.f32.xlu0 %v143_v31 }
 0x126   :  { %147 = vadd.xlane.f32.xlu0 %v144_v32 }
 0x1af   :  { %v146_v33 = vpop.xlane.xlu0 %145 }
 0x1b0   :  { %280 = vrsqrt.f32 %v146_v33  ;;  %vm151_vm0 = vcmp.eq.f32.partialorder %v146_v33, inf  ;;  %v154_v37 = vand.u32 2147483648, %v146_v33  ;;  %vm153_vm1 = vcmp.eq.f32.partialorder %v146_v33, 0.0 }
 0x1b3   :  { %v148_v34 = vpop.xlane.xlu0 %147 }
 0x1b4   :  { %282 = vrsqrt.f32 %v148_v34  ;;  %vm158_vm2 = vcmp.eq.f32.partialorder %v148_v34, inf  ;;  %v161_v43 = vand.u32 2147483648, %v148_v34  ;;  %vm160_vm3 = vcmp.eq.f32.partialorder %v148_v34, 0.0 }
 0x1ba   :  { %v281_v35 = vpop.eup %280 }
 0x1bb   :  { %v150_v36 = vmul.f32 %v281_v35, %v146_v33 }
 0x1bd   :  { %v152_v38 = vsel %vm151_vm0, %v146_v33, %v150_v36 }
 0x1be   :  { %v283_v39 = vpop.eup %282  ;;  %v155_v40 = vsel %vm153_vm1, %v154_v37, %v152_v38 }
 0x1bf   :  { %v163_v41 = vadd.f32 1e-08, %v155_v40  ;;  %v157_v42 = vmul.f32 %v283_v39, %v148_v34 }
 0x1c1   :  { %284 = vrcp.f32 %v163_v41  ;;  %v159_v44 = vsel %vm158_vm2, %v148_v34, %v157_v42 }
 0x1c2   :  { %v162_v45 = vsel %vm160_vm3, %v161_v43, %v159_v44 }
 0x1c3   :  { %v164_v46 = vadd.f32 1e-08, %v162_v45 }
 0x1c5   :  { %286 = vrcp.f32 %v164_v46 }
 0x1cb   :  { %v285_v47 = vpop.eup %284 }
 0x1cc   :  { %v167_v48 = vmul.f32 %v285_v47, %v135_v29 }
 0x1ce   :  { %169 = vst [vmem:[#allocation7] sm:$0xff] %v167_v48 }
 0x1cf   :  { %v287_v49 = vpop.eup %286 }
 0x1d0   :  { %v168_v50 = vmul.f32 %v287_v49, %v140_v30 }
 0x1d2   :  { %170 = vst [vmem:[#allocation7 + $0x8] sm:$0xff] %v168_v50 }
 0x1d3   :  { %343 = shalt.err (!%p340_p6)
}
 0x1d4   :  { %s344_s15 = scalar_lea.hbm %s436_s3, 256 }
 0x1d5   :  { %p345_p7 = scmp.ne.s32.totalorder %s436_s3, %s344_s15  ;;  %p348_p8 = scmp.lt.u32.totalorder %s344_s15, %s436_s3 }
 0x1d7   :  { %p350_p9 = pnand %p348_p8, %p345_p7 }
 0x1d9   :  { %353 = shalt.err (!%p350_p9)
}
 0x1da   :  { %182 = dma.vmem_to_hbm [thread:$0]  %s177_s11, 256, %s436_s3, [#allocation4], %s361_s22, %s361_s22, %s362_s23  }
 0x1db   :  { %358 = dma.done.wait [#allocation4], 256  }
 0x1dc   :  { %359 = vsyncadd [#allocation4], 4294967040 }
 0x1dd   :  { %186 = vsyncpa [#allocation3], 1 }
 0x1de   :  { %187 = vsyncpa [#allocation6], 1 }
 0x1df   :  { %188 = vsyncpa [#allocation4], 1 }

</bundles_post_ra>
